<compile_context>
chip_gen: v6e
topology: v6e:2x2x1
jax: 0.10.0
libtpu: 0.0.40
codegen_flags: <defaults>
</compile_context>

<pallas_src>
import functools
import math

import jax
import jax.numpy as jnp
from jax.experimental import pallas as pl
from jax.experimental.pallas import tpu as pltpu

TREF = 10.0   # self.Tref
T0 = 46.02    # self.T0

RELU_SLOPE = 0.0     # ReLU
LEAKY_SLOPE = 0.01   # LeakyReLU(0.01)
IDENT_SLOPE = 1.0    # identity


# ---------------------------------------------------------------------------
# Parameter construction (deterministic, PyTorch-Linear-like uniform init)
# ---------------------------------------------------------------------------
def _linear_init(key, fan_in, fan_out):
    kw, kb = jax.random.split(key)
    bound = 1.0 / math.sqrt(fan_in)
    W = jax.random.uniform(kw, (fan_in, fan_out), jnp.float32, -bound, bound)
    b = jax.random.uniform(kb, (1, fan_out), jnp.float32, -bound, bound)
    return W, b


def build_pernn_params(key, input_dim, latent_dim, encoder_dims,
                       residual_dims, decoder_dims):
    """Per-head parameters. Weights stored as (in, out) so y = x @ W + b."""
    def mlp(key, in_dim, hidden, out_dim):
        layers = []
        d = in_dim
        for h in list(hidden) + [out_dim]:
            key, sub = jax.random.split(key)
            layers.append(_linear_init(sub, d, h))
            d = h
        return key, layers

    params = {}
    key, params['encoder'] = mlp(key, input_dim, encoder_dims, latent_dim)
    key, params['residual'] = mlp(key, latent_dim, residual_dims, 1)
    key, params['nee'] = mlp(key, latent_dim, decoder_dims, 1)
    key, params['temp'] = mlp(key, latent_dim, decoder_dims, 1)
    key, params['k'] = mlp(key, latent_dim, decoder_dims, 2)
    return params


def build_kernel_operands(params):
    """Feature-major kernel operands + static per-layer activation kinds.

    Operand order:
      [Wt0_x (H0, F-1), w0_b (H0, 1), b0 (H0, 1)]        # first encoder layer
      then per remaining encoder layer: [Wt (out,in), b (out,1)]
      then per fused head layer:        [Wt, b, slope (out,1)]
    Fused output row order: [nee, dT, k0, k1, residual].
    """
    enc = params['encoder']
    n_enc = len(enc)
    heads = ['nee', 'temp', 'k', 'residual']
    hidden_slope = {'nee': RELU_SLOPE, 'temp': RELU_SLOPE,
                    'k': LEAKY_SLOPE, 'residual': RELU_SLOPE}
    final_slope = {'nee': IDENT_SLOPE, 'temp': IDENT_SLOPE,
                   'k': LEAKY_SLOPE, 'residual': IDENT_SLOPE}
    n_head_layers = len(params['nee'])
    # TODO(synk): heads of unequal depth would need identity padding layers.
    assert all(len(params[h]) == n_head_layers for h in heads), \
        "head fusion needs equal depth"

    operands = []
    layer_acts = []   # 'relu' | 'none' | 'slope' per layer

    # ---- encoder first layer: split W into x-part and b-column ------------
    W0, b0 = enc[0]                       # (input_dim, H0), (1, H0)
    Wt0 = W0.T                            # (H0, input_dim)
    operands += [Wt0[:, :-1], Wt0[:, -1:], b0.T]
    layer_acts.append('relu' if n_enc > 1 else 'none')

    # ---- remaining encoder layers ------------------------------------------
    for li in range(1, n_enc):
        W, b = enc[li]
        operands += [W.T, b.T]
        layer_acts.append('relu' if li < n_enc - 1 else 'none')

    # ---- fused heads --------------------------------------------------------
    for li in range(n_head_layers):
        Wts = [params[h][li][0].T for h in heads]    # each (out_h, in_h)
        bcs = [params[h][li][1].T for h in heads]    # each (out_h, 1)
        is_last = li == n_head_layers - 1
        if li == 0:                                   # shared input z -> stack rows
            Wt = jnp.concatenate(Wts, axis=0)
        else:                                         # independent heads -> block diag
            rows = sum(w.shape[0] for w in Wts)
            cols = sum(w.shape[1] for w in Wts)
            Wt = jnp.zeros((rows, cols), jnp.float32)
            r = c = 0
            for w in Wts:
                Wt = Wt.at[r:r + w.shape[0], c:c + w.shape[1]].set(w)
                r += w.shape[0]
                c += w.shape[1]
        bc = jnp.concatenate(bcs, axis=0)
        sd = final_slope if is_last else hidden_slope
        slope = jnp.concatenate(
            [jnp.full((w.shape[0], 1), sd[h], jnp.float32)
             for h, w in zip(heads, Wts)], axis=0)
        operands += [Wt, bc, slope]
        layer_acts.append('slope')

    return operands, tuple(layer_acts), n_enc


# ---------------------------------------------------------------------------
# Pallas kernel (feature-major: every activation is (features, batch_tile))
# ---------------------------------------------------------------------------
def _pernn_kernel(layer_acts, n_enc, latent_dim, mm_dtype,
                  x_ref, b_ref, T_ref, *refs):
    out_ref = refs[-1]
    w_refs = refs[:-1]

    def apply_act(y, act, slope_ref):
        if act == 'relu':
            return jnp.maximum(y, 0.0)
        if act == 'none':
            return y
        slope = slope_ref[...]                 # (out_f, 1), broadcast over lanes
        return jnp.where(y > 0, y, slope * y)

    # ---- first encoder layer: W_x @ x + w_b * b + bias ---------------------
    w0x = w_refs[0][...]                       # (H0, F-1)
    w0b = w_refs[1][...]                       # (H0, 1)
    bc0 = w_refs[2][...]                       # (H0, 1)
    idx = 3
    y = (jnp.dot(w0x.astype(mm_dtype), x_ref[...].astype(mm_dtype),
                 preferred_element_type=jnp.float32)
         + w0b * b_ref[...] + bc0)
    slope_ref = None
    if layer_acts[0] == 'slope':
        slope_ref = w_refs[idx]
        idx += 1
    h = apply_act(y, layer_acts[0], slope_ref)
    z = h if n_enc == 1 else None

    # ---- remaining layers (encoder tail + fused heads) ----------------------
    for li, act in enumerate(layer_acts[1:], start=1):
        Wt = w_refs[idx][...]
        bc = w_refs[idx + 1][...]
        idx += 2
        slope_ref = None
        if act == 'slope':
            slope_ref = w_refs[idx]
            idx += 1
        y = jnp.dot(Wt.astype(mm_dtype), h.astype(mm_dtype),
                    preferred_element_type=jnp.float32) + bc
        h = apply_act(y, act, slope_ref)
        if li == n_enc - 1:
            z = h                              # (latent, TB)

    # fused head output rows: [nee, dT_dt, E0, rb, residual]
    dT_dt = h[1:2, :]
    E0 = h[2:3, :]
    rb = h[3:4, :]
    residual = h[4:5, :]

    # Physics epilogue (f32, lane-dense)
    T = T_ref[...]                             # (1, TB)
    d = T - T0
    inv_d = pl.reciprocal(d, approx=False)
    c0 = 1.0 / (TREF - T0)                     # hoisted constant
    f = rb * E0 * inv_d * inv_d * jnp.exp(E0 * (c0 - inv_d)) * dT_dt + residual

    # Output slab rows: [nee, dT, k0, k1, f, z...].  All stores are lane-full;
    # the HBM writeback is one full-block DMA handled by the pipeline.
    out_ref[0:4, :] = h[0:4, :]
    out_ref[4:5, :] = f
    out_ref[5:5 + latent_dim, :] = z


def pernn_forward(x, b, T, operands, layer_acts, n_enc, latent_dim,
                  batch_tile=1024, matmul_dtype=jnp.float32):
    """x: (N, input_dim-1), b: (N,), T: (N,).

    batch_tile must be a multiple of 128 (batch sits on the lane axis).
    matmul_dtype stays f32 by default; bf16 only helps if the MXU-push slot
    binds (never on v5e: no bf16 VPU there).
    """
    assert batch_tile % 128 == 0, "batch_tile must be a multiple of 128"
    N = x.shape[0]

    # Feature-major inputs (no (N, input_dim) concat materialized).
    x_t = x.T.astype(jnp.float32)                    # (F-1, N)
    b_row = b.reshape(1, -1).astype(jnp.float32)     # (1, N)
    T_row = T.reshape(1, -1).astype(jnp.float32)     # (1, N)

    n_tiles = pl.cdiv(N, batch_tile)
    N_pad = n_tiles * batch_tile
    pad = N_pad - N
    if pad:
        x_t = jnp.pad(x_t, ((0, 0), (0, pad)))
        b_row = jnp.pad(b_row, ((0, 0), (0, pad)))
        T_row = jnp.pad(T_row, ((0, 0), (0, pad)))

    out_width = 5 + latent_dim

    def batch_spec(rows):
        return pl.BlockSpec((rows, batch_tile), lambda i: (0, i))

    in_specs = [batch_spec(x_t.shape[0]), batch_spec(1), batch_spec(1)]
    # Weights: full blocks, grid-invariant (DMA'd once, stay resident in VMEM).
    in_specs += [pl.BlockSpec(op.shape, lambda i: (0, 0)) for op in operands]

    kernel = functools.partial(_pernn_kernel, layer_acts, n_enc, latent_dim,
                               matmul_dtype)

    slab = pl.pallas_call(
        kernel,
        out_shape=jax.ShapeDtypeStruct((out_width, N_pad), jnp.float32),
        grid_spec=pltpu.PrefetchScalarGridSpec(
            num_scalar_prefetch=0,
            grid=(n_tiles,),
            in_specs=in_specs,
            out_specs=batch_spec(out_width),
        ),
        compiler_params=pltpu.CompilerParams(
            dimension_semantics=("parallel",)),
    )(x_t, b_row, T_row, *operands)

    nee = slab[0:1, :N].T
    dT_dt = slab[1:2, :N].T
    k = slab[2:4, :N].T
    f = slab[4:5, :N].T
    z = slab[5:5 + latent_dim, :N].T
    return nee, dT_dt, k, f, z


# ---------------------------------------------------------------------------
# Pure-JAX reference (mirrors the PyTorch forward, per-head params)
# ---------------------------------------------------------------------------
def pernn_reference(x, b, T, params):
    def run(h, layers, hidden_act, final_act):
        n = len(layers)
        for i, (W, bb) in enumerate(layers):
            h = h @ W + bb
            act = final_act if i == n - 1 else hidden_act
            if act == 'relu':
                h = jnp.maximum(h, 0.0)
            elif act == 'leaky':
                h = jnp.where(h > 0, h, 0.01 * h)
        return h

    inp = jnp.concatenate([x, b[:, None]], axis=1)
    T2 = T.reshape(-1, 1)
    z = run(inp, params['encoder'], 'relu', 'none')
    residual = run(z, params['residual'], 'relu', 'none')
    nee = run(z, params['nee'], 'relu', 'none')
    dT_dt = run(z, params['temp'], 'relu', 'none')
    k = run(z, params['k'], 'leaky', 'leaky')
    E0, rb = k[:, 0:1], k[:, 1:2]
    exp_term = jnp.exp(E0 * (1.0 / (TREF - T0) - 1.0 / (T2 - T0)))
    dNEE_dT = rb * (E0 / (T2 - T0) ** 2) * exp_term
    f = dNEE_dT * dT_dt + residual
    return nee, dT_dt, k, f, z


if __name__ == "__main__":
    # Small, forward-consistent shapes.
    INPUT_DIM = 8          # encoder input = cat(x, b) -> x has INPUT_DIM - 1 features
    LATENT_DIM = 16
    ENCODER_DIMS = [32, 32]
    RESIDUAL_DIMS = [32]
    DECODER_DIMS = [32]
    N = 600                # not a multiple of the tile -> exercises the padding path
    BATCH_TILE = 256       # default is 1024; 256 keeps the demo at >1 grid step

    key = jax.random.PRNGKey(0)
    kp, kx, kb, kT = jax.random.split(key, 4)

    params = build_pernn_params(kp, INPUT_DIM, LATENT_DIM, ENCODER_DIMS,
                                RESIDUAL_DIMS, DECODER_DIMS)
    operands, layer_acts, n_enc = build_kernel_operands(params)

    x = jax.random.normal(kx, (N, INPUT_DIM - 1), jnp.float32)
    b = jax.random.normal(kb, (N,), jnp.float32)
    # Temperatures around 10 C (well away from the T0=46.02 singularity).
    T = 10.0 + 5.0 * jax.random.normal(kT, (N,), jnp.float32)

    outs = pernn_forward(x, b, T, operands, layer_acts, n_enc, LATENT_DIM,
                         batch_tile=BATCH_TILE)
    outs = jax.block_until_ready(outs)

    refs = pernn_reference(x, b, T, params)
    names = ("nee", "dT_dt", "k_pred", "f", "z")
    for name, o, r in zip(names, outs, refs):
        assert o.shape == r.shape, (name, o.shape, r.shape)
        assert jnp.allclose(o, r, atol=1e-4, rtol=1e-4), f"mismatch in {name}"

    print("KERNEL_OK")
</pallas_src>

<mosaic_0001>
module attributes {stable_mosaic.version = 11 : i64} {
  func.func @_pernn_kernel(%arg0: i32, %arg1: memref<7x256xf32, #tpu.memory_space<vmem>>, %arg2: memref<1x256xf32, #tpu.memory_space<vmem>>, %arg3: memref<1x256xf32, #tpu.memory_space<vmem>>, %arg4: memref<32x7xf32, #tpu.memory_space<vmem>>, %arg5: memref<32x1xf32, #tpu.memory_space<vmem>>, %arg6: memref<32x1xf32, #tpu.memory_space<vmem>>, %arg7: memref<32x32xf32, #tpu.memory_space<vmem>>, %arg8: memref<32x1xf32, #tpu.memory_space<vmem>>, %arg9: memref<16x32xf32, #tpu.memory_space<vmem>>, %arg10: memref<16x1xf32, #tpu.memory_space<vmem>>, %arg11: memref<128x16xf32, #tpu.memory_space<vmem>>, %arg12: memref<128x1xf32, #tpu.memory_space<vmem>>, %arg13: memref<128x1xf32, #tpu.memory_space<vmem>>, %arg14: memref<5x128xf32, #tpu.memory_space<vmem>>, %arg15: memref<5x1xf32, #tpu.memory_space<vmem>>, %arg16: memref<5x1xf32, #tpu.memory_space<vmem>>, %arg17: memref<21x256xf32, #tpu.memory_space<vmem>>) attributes {dimension_semantics = [#tpu.dimension_semantics<parallel>], iteration_bounds = array<i64: 3>, scalar_prefetch = 0 : i64, scratch_operands = 0 : i64, tpu.core_type = #tpu.core_type<tc>, window_params = [{transform_indices = @transform_0, window_bounds = array<i64: 7, 256>}, {transform_indices = @transform_1, window_bounds = array<i64: 1, 256>}, {transform_indices = @transform_2, window_bounds = array<i64: 1, 256>}, {pipeline_mode = #tpu.pipeline_mode<synchronous>, transform_indices = @transform_3, window_bounds = array<i64: 32, 7>}, {pipeline_mode = #tpu.pipeline_mode<synchronous>, transform_indices = @transform_4, window_bounds = array<i64: 32, 1>}, {pipeline_mode = #tpu.pipeline_mode<synchronous>, transform_indices = @transform_5, window_bounds = array<i64: 32, 1>}, {pipeline_mode = #tpu.pipeline_mode<synchronous>, transform_indices = @transform_6, window_bounds = array<i64: 32, 32>}, {pipeline_mode = #tpu.pipeline_mode<synchronous>, transform_indices = @transform_7, window_bounds = array<i64: 32, 1>}, {pipeline_mode = #tpu.pipeline_mode<synchronous>, transform_indices = @transform_8, window_bounds = array<i64: 16, 32>}, {pipeline_mode = #tpu.pipeline_mode<synchronous>, transform_indices = @transform_9, window_bounds = array<i64: 16, 1>}, {pipeline_mode = #tpu.pipeline_mode<synchronous>, transform_indices = @transform_10, window_bounds = array<i64: 128, 16>}, {pipeline_mode = #tpu.pipeline_mode<synchronous>, transform_indices = @transform_11, window_bounds = array<i64: 128, 1>}, {pipeline_mode = #tpu.pipeline_mode<synchronous>, transform_indices = @transform_12, window_bounds = array<i64: 128, 1>}, {pipeline_mode = #tpu.pipeline_mode<synchronous>, transform_indices = @transform_13, window_bounds = array<i64: 5, 128>}, {pipeline_mode = #tpu.pipeline_mode<synchronous>, transform_indices = @transform_14, window_bounds = array<i64: 5, 1>}, {pipeline_mode = #tpu.pipeline_mode<synchronous>, transform_indices = @transform_15, window_bounds = array<i64: 5, 1>}, {transform_indices = @transform_16, window_bounds = array<i64: 21, 256>}]} {
    %c0 = arith.constant 0 : index
    %c0_0 = arith.constant 0 : index
    %0 = vector.load %arg4[%c0, %c0_0] : memref<32x7xf32, #tpu.memory_space<vmem>>, vector<32x7xf32>
    %c0_1 = arith.constant 0 : index
    %c0_2 = arith.constant 0 : index
    %1 = vector.load %arg5[%c0_1, %c0_2] : memref<32x1xf32, #tpu.memory_space<vmem>>, vector<32x1xf32>
    %c0_3 = arith.constant 0 : index
    %c0_4 = arith.constant 0 : index
    %2 = vector.load %arg6[%c0_3, %c0_4] : memref<32x1xf32, #tpu.memory_space<vmem>>, vector<32x1xf32>
    %c0_5 = arith.constant 0 : index
    %c0_6 = arith.constant 0 : index
    %3 = vector.load %arg1[%c0_5, %c0_6] : memref<7x256xf32, #tpu.memory_space<vmem>>, vector<7x256xf32>
    %cst = arith.constant dense<0.000000e+00> : vector<32x256xf32>
    %4 = tpu.matmul %0, %3, %cst {dimension_numbers = #tpu.dot_dimension_numbers<[1], [0], [0], [1], [0, 0, 1, 1], [], []>} : vector<32x7xf32>, vector<7x256xf32>, vector<32x256xf32> -> vector<32x256xf32>
    %c0_7 = arith.constant 0 : index
    %c0_8 = arith.constant 0 : index
    %5 = vector.load %arg2[%c0_7, %c0_8] : memref<1x256xf32, #tpu.memory_space<vmem>>, vector<1x256xf32>
    %6 = vector.broadcast %1 : vector<32x1xf32> to vector<32x256xf32>
    %7 = vector.broadcast %5 : vector<1x256xf32> to vector<32x256xf32>
    %8 = arith.mulf %6, %7 : vector<32x256xf32>
    %9 = arith.addf %4, %8 : vector<32x256xf32>
    %10 = vector.broadcast %2 : vector<32x1xf32> to vector<32x256xf32>
    %11 = arith.addf %9, %10 : vector<32x256xf32>
    %cst_9 = arith.constant 0.000000e+00 : f32
    %12 = vector.broadcast %cst_9 : f32 to vector<32x256xf32>
    %13 = arith.maximumf %11, %12 : vector<32x256xf32>
    %c0_10 = arith.constant 0 : index
    %c0_11 = arith.constant 0 : index
    %14 = vector.load %arg7[%c0_10, %c0_11] : memref<32x32xf32, #tpu.memory_space<vmem>>, vector<32x32xf32>
    %c0_12 = arith.constant 0 : index
    %c0_13 = arith.constant 0 : index
    %15 = vector.load %arg8[%c0_12, %c0_13] : memref<32x1xf32, #tpu.memory_space<vmem>>, vector<32x1xf32>
    %cst_14 = arith.constant dense<0.000000e+00> : vector<32x256xf32>
    %16 = tpu.matmul %14, %13, %cst_14 {dimension_numbers = #tpu.dot_dimension_numbers<[1], [0], [0], [1], [0, 0, 1, 1], [], []>} : vector<32x32xf32>, vector<32x256xf32>, vector<32x256xf32> -> vector<32x256xf32>
    %17 = vector.broadcast %15 : vector<32x1xf32> to vector<32x256xf32>
    %18 = arith.addf %16, %17 : vector<32x256xf32>
    %cst_15 = arith.constant 0.000000e+00 : f32
    %19 = vector.broadcast %cst_15 : f32 to vector<32x256xf32>
    %20 = arith.maximumf %18, %19 : vector<32x256xf32>
    %c0_16 = arith.constant 0 : index
    %c0_17 = arith.constant 0 : index
    %21 = vector.load %arg9[%c0_16, %c0_17] : memref<16x32xf32, #tpu.memory_space<vmem>>, vector<16x32xf32>
    %c0_18 = arith.constant 0 : index
    %c0_19 = arith.constant 0 : index
    %22 = vector.load %arg10[%c0_18, %c0_19] : memref<16x1xf32, #tpu.memory_space<vmem>>, vector<16x1xf32>
    %cst_20 = arith.constant dense<0.000000e+00> : vector<16x256xf32>
    %23 = tpu.matmul %21, %20, %cst_20 {dimension_numbers = #tpu.dot_dimension_numbers<[1], [0], [0], [1], [0, 0, 1, 1], [], []>} : vector<16x32xf32>, vector<32x256xf32>, vector<16x256xf32> -> vector<16x256xf32>
    %24 = vector.broadcast %22 : vector<16x1xf32> to vector<16x256xf32>
    %25 = arith.addf %23, %24 : vector<16x256xf32>
    %c0_21 = arith.constant 0 : index
    %c0_22 = arith.constant 0 : index
    %26 = vector.load %arg11[%c0_21, %c0_22] : memref<128x16xf32, #tpu.memory_space<vmem>>, vector<128x16xf32>
    %c0_23 = arith.constant 0 : index
    %c0_24 = arith.constant 0 : index
    %27 = vector.load %arg12[%c0_23, %c0_24] : memref<128x1xf32, #tpu.memory_space<vmem>>, vector<128x1xf32>
    %cst_25 = arith.constant dense<0.000000e+00> : vector<128x256xf32>
    %28 = tpu.matmul %26, %25, %cst_25 {dimension_numbers = #tpu.dot_dimension_numbers<[1], [0], [0], [1], [0, 0, 1, 1], [], []>} : vector<128x16xf32>, vector<16x256xf32>, vector<128x256xf32> -> vector<128x256xf32>
    %29 = vector.broadcast %27 : vector<128x1xf32> to vector<128x256xf32>
    %30 = arith.addf %28, %29 : vector<128x256xf32>
    %c0_26 = arith.constant 0 : index
    %c0_27 = arith.constant 0 : index
    %31 = vector.load %arg13[%c0_26, %c0_27] : memref<128x1xf32, #tpu.memory_space<vmem>>, vector<128x1xf32>
    %cst_28 = arith.constant 0.000000e+00 : f32
    %32 = vector.broadcast %cst_28 : f32 to vector<128x256xf32>
    %33 = arith.cmpf ogt, %30, %32 : vector<128x256xf32>
    %34 = vector.broadcast %31 : vector<128x1xf32> to vector<128x256xf32>
    %35 = arith.mulf %34, %30 : vector<128x256xf32>
    %36 = arith.select %33, %30, %35 : vector<128x256xi1>, vector<128x256xf32>
    %c0_29 = arith.constant 0 : index
    %c0_30 = arith.constant 0 : index
    %37 = vector.load %arg14[%c0_29, %c0_30] : memref<5x128xf32, #tpu.memory_space<vmem>>, vector<5x128xf32>
    %c0_31 = arith.constant 0 : index
    %c0_32 = arith.constant 0 : index
    %38 = vector.load %arg15[%c0_31, %c0_32] : memref<5x1xf32, #tpu.memory_space<vmem>>, vector<5x1xf32>
    %cst_33 = arith.constant dense<0.000000e+00> : vector<5x256xf32>
    %39 = tpu.matmul %37, %36, %cst_33 {dimension_numbers = #tpu.dot_dimension_numbers<[1], [0], [0], [1], [0, 0, 1, 1], [], []>} : vector<5x128xf32>, vector<128x256xf32>, vector<5x256xf32> -> vector<5x256xf32>
    %40 = vector.broadcast %38 : vector<5x1xf32> to vector<5x256xf32>
    %41 = arith.addf %39, %40 : vector<5x256xf32>
    %c0_34 = arith.constant 0 : index
    %c0_35 = arith.constant 0 : index
    %42 = vector.load %arg16[%c0_34, %c0_35] : memref<5x1xf32, #tpu.memory_space<vmem>>, vector<5x1xf32>
    %cst_36 = arith.constant 0.000000e+00 : f32
    %43 = vector.broadcast %cst_36 : f32 to vector<5x256xf32>
    %44 = arith.cmpf ogt, %41, %43 : vector<5x256xf32>
    %45 = vector.broadcast %42 : vector<5x1xf32> to vector<5x256xf32>
    %46 = arith.mulf %45, %41 : vector<5x256xf32>
    %47 = arith.select %44, %41, %46 : vector<5x256xi1>, vector<5x256xf32>
    %48 = vector.extract_strided_slice %47 {offsets = [1, 0], sizes = [1, 256], strides = [1, 1]} : vector<5x256xf32> to vector<1x256xf32>
    %49 = vector.extract_strided_slice %47 {offsets = [2, 0], sizes = [1, 256], strides = [1, 1]} : vector<5x256xf32> to vector<1x256xf32>
    %50 = vector.extract_strided_slice %47 {offsets = [3, 0], sizes = [1, 256], strides = [1, 1]} : vector<5x256xf32> to vector<1x256xf32>
    %51 = vector.extract_strided_slice %47 {offsets = [4, 0], sizes = [1, 256], strides = [1, 1]} : vector<5x256xf32> to vector<1x256xf32>
    %c0_37 = arith.constant 0 : index
    %c0_38 = arith.constant 0 : index
    %52 = vector.load %arg3[%c0_37, %c0_38] : memref<1x256xf32, #tpu.memory_space<vmem>>, vector<1x256xf32>
    %cst_39 = arith.constant 4.602000e+01 : f32
    %53 = vector.broadcast %cst_39 : f32 to vector<1x256xf32>
    %54 = arith.subf %52, %53 : vector<1x256xf32>
    %55 = tpu.reciprocal %54 : vector<1x256xf32> -> vector<1x256xf32>
    %56 = arith.mulf %50, %49 : vector<1x256xf32>
    %57 = arith.mulf %56, %55 : vector<1x256xf32>
    %58 = arith.mulf %57, %55 : vector<1x256xf32>
    %cst_40 = arith.constant -0.0277623534 : f32
    %59 = vector.broadcast %cst_40 : f32 to vector<1x256xf32>
    %60 = arith.subf %59, %55 : vector<1x256xf32>
    %61 = arith.mulf %49, %60 : vector<1x256xf32>
    %62 = math.exp %61 : vector<1x256xf32>
    %63 = arith.mulf %58, %62 : vector<1x256xf32>
    %64 = arith.mulf %63, %48 : vector<1x256xf32>
    %65 = arith.addf %64, %51 : vector<1x256xf32>
    %66 = vector.extract_strided_slice %47 {offsets = [0, 0], sizes = [4, 256], strides = [1, 1]} : vector<5x256xf32> to vector<4x256xf32>
    %c0_41 = arith.constant 0 : index
    %c0_42 = arith.constant 0 : index
    %67 = vector.load %arg17[%c0_41, %c0_42] : memref<21x256xf32, #tpu.memory_space<vmem>>, vector<4x256xf32>
    tpu.vector_store %arg17[%c0_41, %c0_42], %66 {strides = array<i32>} : memref<21x256xf32, #tpu.memory_space<vmem>>, vector<4x256xf32>,
    %c4 = arith.constant 4 : index
    %c0_43 = arith.constant 0 : index
    %68 = vector.load %arg17[%c4, %c0_43] : memref<21x256xf32, #tpu.memory_space<vmem>>, vector<1x256xf32>
    tpu.vector_store %arg17[%c4, %c0_43], %65 {strides = array<i32>} : memref<21x256xf32, #tpu.memory_space<vmem>>, vector<1x256xf32>,
    %c5 = arith.constant 5 : index
    %c0_44 = arith.constant 0 : index
    %69 = vector.load %arg17[%c5, %c0_44] : memref<21x256xf32, #tpu.memory_space<vmem>>, vector<16x256xf32>
    tpu.vector_store %arg17[%c5, %c0_44], %25 {strides = array<i32>} : memref<21x256xf32, #tpu.memory_space<vmem>>, vector<16x256xf32>,
    return
  }
  func.func @transform_0(%arg0: i32) -> (i32, i32) {
    %c0_i32 = arith.constant 0 : i32
    %c0_i32_0 = arith.constant 0 : i32
    return %c0_i32, %arg0 : i32, i32
  }
  func.func @transform_1(%arg0: i32) -> (i32, i32) {
    %c0_i32 = arith.constant 0 : i32
    %c0_i32_0 = arith.constant 0 : i32
    return %c0_i32, %arg0 : i32, i32
  }
  func.func @transform_2(%arg0: i32) -> (i32, i32) {
    %c0_i32 = arith.constant 0 : i32
    %c0_i32_0 = arith.constant 0 : i32
    return %c0_i32, %arg0 : i32, i32
  }
  func.func @transform_3(%arg0: i32) -> (i32, i32) {
    %c0_i32 = arith.constant 0 : i32
    %c0_i32_0 = arith.constant 0 : i32
    %c0_i32_1 = arith.constant 0 : i32
    return %c0_i32, %c0_i32_0 : i32, i32
  }
  func.func @transform_4(%arg0: i32) -> (i32, i32) {
    %c0_i32 = arith.constant 0 : i32
    %c0_i32_0 = arith.constant 0 : i32
    %c0_i32_1 = arith.constant 0 : i32
    return %c0_i32, %c0_i32_0 : i32, i32
  }
  func.func @transform_5(%arg0: i32) -> (i32, i32) {
    %c0_i32 = arith.constant 0 : i32
    %c0_i32_0 = arith.constant 0 : i32
    %c0_i32_1 = arith.constant 0 : i32
    return %c0_i32, %c0_i32_0 : i32, i32
  }
  func.func @transform_6(%arg0: i32) -> (i32, i32) {
    %c0_i32 = arith.constant 0 : i32
    %c0_i32_0 = arith.constant 0 : i32
    %c0_i32_1 = arith.constant 0 : i32
    return %c0_i32, %c0_i32_0 : i32, i32
  }
  func.func @transform_7(%arg0: i32) -> (i32, i32) {
    %c0_i32 = arith.constant 0 : i32
    %c0_i32_0 = arith.constant 0 : i32
    %c0_i32_1 = arith.constant 0 : i32
    return %c0_i32, %c0_i32_0 : i32, i32
  }
  func.func @transform_8(%arg0: i32) -> (i32, i32) {
    %c0_i32 = arith.constant 0 : i32
    %c0_i32_0 = arith.constant 0 : i32
    %c0_i32_1 = arith.constant 0 : i32
    return %c0_i32, %c0_i32_0 : i32, i32
  }
  func.func @transform_9(%arg0: i32) -> (i32, i32) {
    %c0_i32 = arith.constant 0 : i32
    %c0_i32_0 = arith.constant 0 : i32
    %c0_i32_1 = arith.constant 0 : i32
    return %c0_i32, %c0_i32_0 : i32, i32
  }
  func.func @transform_10(%arg0: i32) -> (i32, i32) {
    %c0_i32 = arith.constant 0 : i32
    %c0_i32_0 = arith.constant 0 : i32
    %c0_i32_1 = arith.constant 0 : i32
    return %c0_i32, %c0_i32_0 : i32, i32
  }
  func.func @transform_11(%arg0: i32) -> (i32, i32) {
    %c0_i32 = arith.constant 0 : i32
    %c0_i32_0 = arith.constant 0 : i32
    %c0_i32_1 = arith.constant 0 : i32
    return %c0_i32, %c0_i32_0 : i32, i32
  }
  func.func @transform_12(%arg0: i32) -> (i32, i32) {
    %c0_i32 = arith.constant 0 : i32
    %c0_i32_0 = arith.constant 0 : i32
    %c0_i32_1 = arith.constant 0 : i32
    return %c0_i32, %c0_i32_0 : i32, i32
  }
  func.func @transform_13(%arg0: i32) -> (i32, i32) {
    %c0_i32 = arith.constant 0 : i32
    %c0_i32_0 = arith.constant 0 : i32
    %c0_i32_1 = arith.constant 0 : i32
    return %c0_i32, %c0_i32_0 : i32, i32
  }
  func.func @transform_14(%arg0: i32) -> (i32, i32) {
    %c0_i32 = arith.constant 0 : i32
    %c0_i32_0 = arith.constant 0 : i32
    %c0_i32_1 = arith.constant 0 : i32
    return %c0_i32, %c0_i32_0 : i32, i32
  }
  func.func @transform_15(%arg0: i32) -> (i32, i32) {
    %c0_i32 = arith.constant 0 : i32
    %c0_i32_0 = arith.constant 0 : i32
    %c0_i32_1 = arith.constant 0 : i32
    return %c0_i32, %c0_i32_0 : i32, i32
  }
  func.func @transform_16(%arg0: i32) -> (i32, i32) {
    %c0_i32 = arith.constant 0 : i32
    %c0_i32_0 = arith.constant 0 : i32
    return %c0_i32, %arg0 : i32, i32
  }
}

</mosaic_0001>

<bundles_post_ra>
// kernel: tpu_custom_call.1
= control target key start
LH: loop header
LB: loop body
LE: loop exit
PB: predicated region body
PF: predicated region fallthrough
CT: control target
= control target key end

     0   :  { %s2630_s0 = inlined_call_operand.vmem [shape: f32[7,768], index: 0, kind: input, shape index: {}]   ;;  %s2631_s1 = inlined_call_operand.vmem [shape: f32[1,768], index: 1, kind: input, shape index: {}]   ;;  %s2632_s2 = inlined_call_operand.vmem [shape: f32[1,768], index: 2, kind: input, shape index: {}]   ;;  %s2633_s3 = inlined_call_operand.vmem [shape: f32[32,7], index: 3, kind: input, shape index: {}]   ;;  %s2634_s4 = inlined_call_operand.vmem [shape: f32[32,1], index: 4, kind: input, shape index: {}]   ;;  %s2635_s5 = inlined_call_operand.vmem [shape: f32[32,1], index: 5, kind: input, shape index: {}]   ;;  %s2636_s6 = inlined_call_operand.vmem [shape: f32[32,32], index: 6, kind: input, shape index: {}]   ;;  %s2637_s7 = inlined_call_operand.vmem [shape: f32[32,1], index: 7, kind: input, shape index: {}]   ;;  %s2638_s8 = inlined_call_operand.vmem [shape: f32[16,32], index: 8, kind: input, shape index: {}]   ;;  %s2639_s9 = inlined_call_operand.vmem [shape: f32[16,1], index: 9, kind: input, shape index: {}]   ;;  %s2640_s10 = inlined_call_operand.vmem [shape: f32[128,16], index: 10, kind: input, shape index: {}]   ;;  %s2641_s11 = inlined_call_operand.vmem [shape: f32[128,1], index: 11, kind: input, shape index: {}]   ;;  %s2642_s12 = inlined_call_operand.vmem [shape: f32[128,1], index: 12, kind: input, shape index: {}]   ;;  %s2643_s13 = inlined_call_operand.vmem [shape: f32[5,128], index: 13, kind: input, shape index: {}]   ;;  %s2644_s14 = inlined_call_operand.vmem [shape: f32[5,1], index: 14, kind: input, shape index: {}]   ;;  %s2645_s15 = inlined_call_operand.vmem [shape: f32[5,1], index: 15, kind: input, shape index: {}]   ;;  %s2646_s16 = inlined_call_operand.hbm [shape: f32[21,768], index: 16, kind: output, shape index: {}]  }
   0x1   :  { %2659 = sst [smem:[#allocation18_spill]] %s2630_s0 }
   0x2   :  { %21 = vsyncpa [#allocation3], 0 }
   0x3   :  { %23 = vsyncpa [#allocation3 + $0x1], 0  ;;  %s2060_s21 = smov 0   ;;  %s2062_s22 = smov 0  }
   0x4   :  { %s2064_s23 = smov 0   ;;  %s2066_s24 = smov 0  }
   0x5 LB: > { %2660 = sst [smem:[#allocation5_spill]] %s1954_s21  ;;  %s2081_s25 = sadd.s32 4294967295, %s1966_s24   ;;  %s1966_s24 = sphi %s2066_s24, %s2687_s24   ;;  %s1962_s23 = sphi %s2064_s23, %s2689_s23   ;;  %s1958_s22 = sphi %s2062_s22, %s2691_s22   ;;  %s1954_s21 = sphi %s2060_s21, %s2690_s21  }
   0x6   : > { %2661 = sst [smem:[#allocation6_spill]] %s1962_s23  ;;  %s1809_s26 = sadd.s32 4294967294, %s1966_s24  }
   0x7   : > { %2662 = sst [smem:[#allocation7_spill]] %s1966_s24  ;;  %s2085_s27 = sadd.s32 1, %s1966_s24  }
   0x8   : > { %2663 = sst [smem:[#allocation8_spill]] %s2085_s27  ;;  %s387_s28 = sadd.s32 1, %s1962_s23 }
   0x9   : > { %s384_s29 = ssub.s32 %s1966_s24, %s2085_s27  ;;  %p397_p0 = scmp.ne.s32.totalorder %s1962_s23, %s1958_s22 }
   0xa   : > { %p385_p1 = scmp.eq.s32.totalorder %s384_s29, 0  ;;  %p398_p2 = scmp.eq.s32.totalorder %s2081_s25, 2 }
   0xb   : > { %p403_p3 = scmp.ne.s32.totalorder %s1958_s22, %s1954_s21  ;;  %p404_p4 = scmp.eq.s32.totalorder %s1809_s26, 2 }
   0xc   : > { %s2096_s30 = scalar_select %p385_p1, %s1962_s23, %s387_s28  }
   0xd   : > { %p2098_p5 = por %p398_p2, %p397_p0  ;;  %p2102_p6 = por %p404_p4, %p403_p3 }
   0xe   : > { %2664 = sst [smem:[#allocation9_spill]] %s2096_s30  ;;  %p1812_p7 = scmp.ge.s32.totalorder %s1966_s24, 1 }
   0xf   : > { %s2666_s17 = scalar_select %p2102_p6, 1, 0 }
  0x10   : > { %p486_p8 = scmp.lt.s32.totalorder %s1966_s24, 4 }
  0x11   : > { %2667 = sst [smem:[#allocation10_spill]] %s2666_s17 }
  0x12   : > { %p487_p9 = pnand %p1812_p7, %p486_p8 }
  0x14   : > { %490 = sbr.rel (%p487_p9) target bundleno = 1224 (0x4c8), region = 84 }
  0x19   : > { %v568_v0 = vld [vmem:[%s2634_s4 + $0x18] sm:$0xff]  ;;  %v566_v1 = vld [vmem:[%s2634_s4 + $0x8] sm:$0xff]  ;;  %s1813_s28 = sshll.u32 %s2081_s25, 1  ;;  %v1968_v2 = vmov 0   ;;  %v567_v3 = vld [vmem:[%s2634_s4 + $0x10] sm:$0xff]  ;;  %v1969_v5 = vmov 0.0   ;;  %v2653_v56 = vlaneseq }
  0x1a   : > { %1899 = vset.pattern.permute.xlu1 %v1968_v2  ;;  %1898 = vset.pattern.permute.xlu0 %v1968_v2  ;;  %p545_p10 = scmp.lt.s32.totalorder %s1813_s28, 5  ;;  %v572_v4 = vld [vmem:[%s2635_s5 + $0x18] sm:$0xff]  ;;  %vm628_vm0 = vcmask 1046528   ;;  %s2668_s30 = sld [smem:[#allocation18_spill]]  ;;  %v571_v6 = vld [vmem:[%s2635_s5 + $0x10] sm:$0xff]  ;;  %v565_v9 = vld [vmem:[%s2634_s4] sm:$0xff] }
  0x1b   : > { %593 = vperm.xlu0 %1898, %v568_v0   ;;  %583 = vperm.xlu1 %1899, %v566_v1   ;;  %v561_v10 = vld [vmem:[%s2633_s3] sm:$0xff]  ;;  %vm615_vm1 = vcmask 56320   ;;  %v570_v12 = vld [vmem:[%s2635_s5 + $0x8] sm:$0xff]  ;;  %v766_v14 = vld [vmem:[%s2637_s7 + $0x10] sm:$0xff]  ;;  %v2282_v57 = vshrl.u32 %v2653_v56, 7  ;;  %vm788_vm2 = vcmask 261120  }
  0x1c   : > { %s2693_s28 = smov (!%p545_p10, %s1813_s28), 5  ;;  %699 = vmatprep.mubr.f32.mxu0 %v1969_v5  ;;  %1220 = vmatprep.mubr.f32.mxu1 %v1969_v5  ;;  %v569_v11 = vld [vmem:[%s2635_s5] sm:$0xff]  ;;  %v562_v13 = vld [vmem:[%s2633_s3 + $0x8] sm:$0xff]  ;;  %v767_v15 = vld [vmem:[%s2637_s7 + $0x18] sm:$0xff]  ;;  %s541_s21 = sand.u32 1, %s1958_s22   ;;  %vm1696_vm3 = vcmask 1044480  }
  0x1d   : > { %s1814_s18 = sshll.u32 %s2693_s28, 3  ;;  %v563_v16 = vld [vmem:[%s2633_s3 + $0x10] sm:$0xff]  ;;  %v764_v17 = vld [vmem:[%s2637_s7] sm:$0xff]  ;;  %v765_v18 = vld [vmem:[%s2637_s7 + $0x8] sm:$0xff]  ;;  %2669 = vst [vmem:[#allocation11_spill] sm:$0xff] %v2282_v57  ;;  %v2289_v62 = vsub.s32 1, %v2282_v57  ;;  %s558_s23 = scalar_lea.vmem %s2632_s2, %s2693_s28 }
  0x1e   : > { %v564_v19 = vld [vmem:[%s2633_s3 + $0x18] sm:$0xff]  ;;  %v900_v20 = vld [vmem:[%s2639_s9] sm:$0xff]  ;;  %v901_v21 = vld [vmem:[%s2639_s9 + $0x8] sm:$0xff]  ;;  %v2292_v63 = vsub.s32 0, %v2282_v57  ;;  %s1852_s24 = smul.u32 48, %s541_s21  ;;  %vm1107_vm4 = vcmask 130048  }
  0x1f   : > { %588 = vperm.xlu0 %1898, %v567_v3   ;;  %741 = vperm.xlu1 %1899, %v572_v4   ;;  %v1025_v22 = vld [vmem:[%s2641_s11 + $0x70] sm:$0xff]  ;;  %v1026_v23 = vld [vmem:[%s2641_s11 + $0x78] sm:$0xff]  ;;  %v1024_v24 = vld [vmem:[%s2641_s11 + $0x68] sm:$0xff]  ;;  %2670 = vst [vmem:[#allocation12_spill] sm:$0xff] %v2289_v62  ;;  %s1851_s27 = sshll.u32 %s2081_s25, 8  ;;  %s2590_s20 = scalar_lea.sflag [#allocation3], %s541_s21 }
  0x20   : > { %s548_s26 = scalar_lea.vmem %s2668_s30, %s1814_s18  ;;  %v1332_v25 = vld [vmem:[%s2642_s12 + $0x78] sm:$0xff]  ;;  %v1023_v26 = vld [vmem:[%s2641_s11 + $0x60] sm:$0xff]  ;;  %v1331_v27 = vld [vmem:[%s2642_s12 + $0x70] sm:$0xff]  ;;  %s553_s30 = scalar_lea.vmem %s2631_s1, %s2693_s28  ;;  %2671 = vst [vmem:[#allocation13_spill] sm:$0xff] %v2292_v63 }
  0x21   : > { %v574_v7 = vld [vmem:[%s548_s26 + $0x8] sm:$0x7f]  ;;  %v573_v8 = vld [vmem:[%s548_s26] sm:$0x7f]  ;;  %v1022_v28 = vld [vmem:[%s2641_s11 + $0x58] sm:$0xff]  ;;  %s2329_s29 = scalar_lea.vmem [#allocation2], %s1852_s24  ;;  %s2585_s19 = scalar_lea.hbm %s2646_s16, %s1851_s27 }
  0x22   : > { %1817 = vmatprep.subr.msk.mxu0 %vm628_vm0, %v574_v7  ;;  %v1330_v29 = vld [vmem:[%s2642_s12 + $0x68] sm:$0xff]  ;;  %v1021_v30 = vld [vmem:[%s2641_s11 + $0x50] sm:$0xff]  ;;  %v1329_v31 = vld [vmem:[%s2642_s12 + $0x60] sm:$0xff]  ;;  %s1729_s28 = sshll.u32 %s2329_s29, 4  ;;  %s1971_s25 = smov [#allocation2]   ;;  %s2579_s28 = int_to_ptr.vmem [resolvable:$true] %s1729_s28 }
  0x23   : > { %1818 = vmatpush1.msk.msra.mxu0 %vm628_vm0, %v573_v8  ;;  %736 = vperm.xlu1 %1899, %v571_v6   ;;  %v1020_v32 = vld [vmem:[%s2641_s11 + $0x48] sm:$0xff]  ;;  %v1328_v33 = vld [vmem:[%s2642_s12 + $0x58] sm:$0xff]  ;;  %v1019_v34 = vld [vmem:[%s2641_s11 + $0x40] sm:$0xff]  ;;  %s1910_s26 = sshll.u32 %s1971_s25, 4  ;;  %s1911_s26 = int_to_ptr.vmem [resolvable:$false] %s1910_s26 }
  0x24   : > { %578 = vperm.xlu0 %1898, %v565_v9   ;;  %1819 = vmatmul.mubr.msk.f32.vlgmr.msra.gmra.mxu0 %vm615_vm1, %v561_v10  ;;  %v1327_v35 = vld [vmem:[%s2642_s12 + $0x50] sm:$0xff]  ;;  %v1018_v36 = vld [vmem:[%s2641_s11 + $0x38] sm:$0xff]  ;;  %v1326_v37 = vld [vmem:[%s2642_s12 + $0x48] sm:$0xff]  ;;  %s1912_s24 = scalar_lea.vmem %s1911_s26, 1536  ;;  %p1913_p0 = scmp.lt.s32.totalorder %s2579_s28, %s1911_s26 }
  0x25   : > { %705 = vmatprep.mubr.f32.mxu0 %v1969_v5  ;;  %v1017_v38 = vld [vmem:[%s2641_s11 + $0x30] sm:$0xff]  ;;  %v1325_v39 = vld [vmem:[%s2642_s12 + $0x40] sm:$0xff]  ;;  %v1016_v40 = vld [vmem:[%s2641_s11 + $0x28] sm:$0xff] }
  0x26   : > { %v1324_v41 = vld [vmem:[%s2642_s12 + $0x38] sm:$0xff]  ;;  %v1015_v42 = vld [vmem:[%s2641_s11 + $0x20] sm:$0xff]  ;;  %v1323_v43 = vld [vmem:[%s2642_s12 + $0x30] sm:$0xff] }
  0x27   : > { %726 = vperm.xlu1 %1899, %v569_v11   ;;  %v1014_v44 = vld [vmem:[%s2641_s11 + $0x18] sm:$0xff]  ;;  %v1322_v45 = vld [vmem:[%s2642_s12 + $0x28] sm:$0xff]  ;;  %v1013_v46 = vld [vmem:[%s2641_s11 + $0x10] sm:$0xff] }
  0x28   : > { %731 = vperm.xlu0 %1898, %v570_v12   ;;  %1820 = vmatmul.mubr.msk.f32.gmra.mxu0 %vm615_vm1, %v562_v13  ;;  %v1321_v47 = vld [vmem:[%s2642_s12 + $0x20] sm:$0xff]  ;;  %v1012_v48 = vld [vmem:[%s2641_s11 + $0x8] sm:$0xff]  ;;  %v1320_v49 = vld [vmem:[%s2642_s12 + $0x18] sm:$0xff] }
  0x29   : > { %711 = vmatprep.mubr.f32.mxu0 %v1969_v5  ;;  %v1011_v50 = vld [vmem:[%s2641_s11] sm:$0xff]  ;;  %v1319_v51 = vld [vmem:[%s2642_s12 + $0x10] sm:$0xff]  ;;  %v1318_v53 = vld [vmem:[%s2642_s12 + $0x8] sm:$0xff] }
  0x2a   : > { %v1317_v52 = vld [vmem:[%s2642_s12] sm:$0xff] }
  0x2b   : > { %780 = vperm.xlu1 %1899, %v766_v14   ;;  %v1587_v54 = vld [vmem:[%s2645_s15] sm:$0x1f] }
  0x2c   : > { %785 = vperm.xlu0 %1898, %v767_v15   ;;  %1821 = vmatmul.mubr.msk.f32.gmra.mxu0 %vm615_vm1, %v563_v16  ;;  %v1510_v55 = vld [vmem:[%s2644_s14] sm:$0x1f] }
  0x2d   : > { %717 = vmatprep.mubr.f32.mxu0 %v1969_v5  ;;  %v575_v1 = vld [vmem:[%s553_s30] sm:$0x3]  ;;  %s1906_s30 = scalar_lea.vmem %s2579_s28, 768 }
  0x2e   : > { %v604_v4 = vrot.slane %v575_v1, %v2289_v62  ;;  %v600_v6 = vrot.slane %v575_v1, %v2292_v63  ;;  %p1907_p11 = scmp.ne.s32.totalorder %s2579_s28, %s1906_s30  ;;  %p1914_p1 = scmp.lt.s32.totalorder %s1912_s24, %s1906_s30 }
  0x2f   : > { %770 = vperm.xlu1 %1899, %v764_v17  }
  0x30   : > { %775 = vperm.xlu0 %1898, %v765_v18   ;;  %1822 = vmatmul.mubr.msk.f32.gmra.mxu0 %vm615_vm1, %v564_v19  ;;  %p1908_p12 = pnand %p1907_p11, %p2098_p5  ;;  %p1915_p2 = por %p1914_p1, %p1913_p0 }
  0x31   : > { %865 = vmatprep.mubr.f32.mxu0 %v1969_v5 }
  0x32   : > { %p1909_p13 = pneg %p1908_p12 }
  0x33   : > { %904 = vperm.xlu1 %1899, %v900_v20  }
  0x34   : > { %909 = vperm.xlu0 %1898, %v901_v21   ;;  %p1916_p3 = pnand %p1915_p2, %p1909_p13 }
  0x37   : > { %1099 = vperm.xlu1 %1899, %v1025_v22  }
  0x38   : > { %1104 = vperm.xlu0 %1898, %v1026_v23  }
  0x3b   : > { %1094 = vperm.xlu1 %1899, %v1024_v24  }
  0x3c   : > { %1442 = vperm.xlu0 %1898, %v1332_v25  }
  0x3f   : > { %1089 = vperm.xlu1 %1899, %v1023_v26  }
  0x40   : > { %1437 = vperm.xlu0 %1898, %v1331_v27  }
  0x43   : > { %1084 = vperm.xlu1 %1899, %v1022_v28  }
  0x44   : > { %1432 = vperm.xlu0 %1898, %v1330_v29  }
  0x47   : > { %1079 = vperm.xlu1 %1899, %v1021_v30  }
  0x48   : > { %1427 = vperm.xlu0 %1898, %v1329_v31  }
  0x4b   : > { %1074 = vperm.xlu1 %1899, %v1020_v32  }
  0x4c   : > { %1422 = vperm.xlu0 %1898, %v1328_v33  }
  0x4f   : > { %1069 = vperm.xlu1 %1899, %v1019_v34  }
  0x50   : > { %1417 = vperm.xlu0 %1898, %v1327_v35  }
  0x53   : > { %1064 = vperm.xlu1 %1899, %v1018_v36  }
  0x54   : > { %1412 = vperm.xlu0 %1898, %v1326_v37  }
  0x57   : > { %1059 = vperm.xlu1 %1899, %v1017_v38  }
  0x58   : > { %1407 = vperm.xlu0 %1898, %v1325_v39  }
  0x5b   : > { %1054 = vperm.xlu1 %1899, %v1016_v40  }
  0x5c   : > { %1402 = vperm.xlu0 %1898, %v1324_v41  }
  0x5f   : > { %1049 = vperm.xlu1 %1899, %v1015_v42  }
  0x60   : > { %1397 = vperm.xlu0 %1898, %v1323_v43  }
  0x63   : > { %1044 = vperm.xlu1 %1899, %v1014_v44  }
  0x64   : > { %1392 = vperm.xlu0 %1898, %v1322_v45  }
  0x67   : > { %1039 = vperm.xlu1 %1899, %v1013_v46  }
  0x68   : > { %1387 = vperm.xlu0 %1898, %v1321_v47  }
  0x6b   : > { %1034 = vperm.xlu1 %1899, %v1012_v48   ;;  %v760_v48 = vld [vmem:[%s2636_s6] sm:$0xff] }
  0x6c   : > { %1382 = vperm.xlu0 %1898, %v1320_v49   ;;  %v761_v49 = vld [vmem:[%s2636_s6 + $0x8] sm:$0xff] }
  0x6f   : > { %1029 = vperm.xlu1 %1899, %v1011_v50   ;;  %v762_v50 = vld [vmem:[%s2636_s6 + $0x10] sm:$0xff] }
  0x70   : > { %1377 = vperm.xlu0 %1898, %v1319_v51   ;;  %v763_v51 = vld [vmem:[%s2636_s6 + $0x18] sm:$0xff] }
  0x73   : > { %1367 = vperm.xlu1 %1899, %v1317_v52  }
  0x74   : > { %1372 = vperm.xlu0 %1898, %v1318_v53  }
  0x77   : > { %1592 = vperm.xlu1 %1899, %v1587_v54  }
  0x78   : > { %1513 = vperm.xlu0 %1898, %v1510_v55  }
  0x96   : > { %v594_v58 = vpop.permute.xlu0 %593  ;;  %v584_v60 = vpop.permute.xlu1 %583 }
  0x97   : > { %v613_v12 = vmul.f32 %v600_v6, %v594_v58  ;;  %v610_v13 = vmul.f32 %v604_v4, %v584_v60  ;;  %v609_v14 = vmul.f32 %v600_v6, %v584_v60  ;;  %v614_v17 = vmul.f32 %v604_v4, %v594_v58 }
  0x9a   : > { %v589_v2 = vpop.permute.xlu0 %588  ;;  %v742_v7 = vpop.permute.xlu1 %741 }
  0x9b   : > { %v612_v9 = vmul.f32 %v604_v4, %v589_v2  ;;  %v611_v10 = vmul.f32 %v600_v6, %v589_v2 }
  0x9e   : > { %v737_v21 = vpop.permute.xlu1 %736 }
  0x9f   : > { %v579_v15 = vpop.permute.xlu0 %578 }
  0xa0   : > { %v608_v18 = vmul.f32 %v604_v4, %v579_v15  ;;  %v607_v22 = vmul.f32 %v600_v6, %v579_v15 }
  0xa2   : > { %v727_v37 = vpop.permute.xlu1 %726 }
  0xa3   : > { %v732_v32 = vpop.permute.xlu0 %731 }
  0xe4   : > { %v701_v59 = vpop.f32.mrf.mxu0 }
  0xe5   : > { %v702_v33 = vadd.f32 %v701_v59, %v607_v22  ;;  %v786_v59 = vpop.permute.xlu0 %785  ;;  %v899_v22 = vld [vmem:[%s2638_s8 + $0x8] sm:$0xff] }
  0xe6   : > { %v703_v61 = vpop.f32.mrf.mxu0 }
  0xe7   : > { %v704_v29 = vadd.f32 %v703_v61, %v608_v18  ;;  %v744_v42 = vadd.f32 %v727_v37, %v702_v33  ;;  %v781_v61 = vpop.permute.xlu1 %780 }
  0xe8   : > { %v707_v0 = vpop.f32.mrf.mxu0 }
  0xe9   : > { %v708_v27 = vadd.f32 %v707_v0, %v609_v14  ;;  %v745_v40 = vadd.f32 %v727_v37, %v704_v29  ;;  %v752_v47 = vmax.f32 %v744_v42, 0.0  ;;  %v776_v6 = vpop.permute.xlu0 %775  ;;  %v998_v42 = vld [vmem:[%s2640_s10 + $0x18] sm:$0xff] }
  0xea   : > { %v709_v3 = vpop.f32.mrf.mxu0 }
  0xeb   : > { %v710_v25 = vadd.f32 %v709_v3, %v610_v13  ;;  %v746_v38 = vadd.f32 %v732_v32, %v708_v27  ;;  %v753_v46 = vmax.f32 %v745_v40, 0.0  ;;  %v996_v40 = vld [vmem:[%s2640_s10 + $0x8] sm:$0xff] }
  0xec   : > { %v713_v8 = vpop.f32.mrf.mxu0 }
  0xed   : > { %v714_v23 = vadd.f32 %v713_v8, %v611_v10  ;;  %v747_v35 = vadd.f32 %v732_v32, %v710_v25  ;;  %v754_v45 = vmax.f32 %v746_v38, 0.0  ;;  %v771_v10 = vpop.permute.xlu1 %770  ;;  %v910_v29 = vpop.permute.xlu0 %909  ;;  %v995_v38 = vld [vmem:[%s2640_s10] sm:$0xff] }
  0xee   : > { %v715_v11 = vpop.f32.mrf.mxu0 }
  0xef   : > { %v716_v19 = vadd.f32 %v715_v11, %v612_v9  ;;  %v748_v34 = vadd.f32 %v737_v21, %v714_v23  ;;  %v755_v44 = vmax.f32 %v747_v35, 0.0 }
  0xf0   : > { %v719_v16 = vpop.f32.mrf.mxu0 }
  0xf1   : > { %v720_v20 = vadd.f32 %v719_v16, %v613_v12  ;;  %v749_v30 = vadd.f32 %v737_v21, %v716_v19  ;;  %v756_v43 = vmax.f32 %v748_v34, 0.0  ;;  %v898_v21 = vld [vmem:[%s2638_s8] sm:$0xff]  ;;  %v905_v23 = vpop.permute.xlu1 %904 }
  0xf2   : > { %v721_v24 = vpop.f32.mrf.mxu0 }
  0xf3   : > { %v722_v26 = vadd.f32 %v721_v24, %v614_v17  ;;  %v750_v28 = vadd.f32 %v742_v7, %v720_v20  ;;  %v757_v41 = vmax.f32 %v749_v30, 0.0 }
  0xf5   : > { %v751_v31 = vadd.f32 %v742_v7, %v722_v26  ;;  %v758_v39 = vmax.f32 %v750_v28, 0.0 }
  0xf7   : > { %v759_v36 = vmax.f32 %v751_v31, 0.0 }
  0xf9   : > { %825 = vmatprep.subr.mxu0 %v759_v36 }
  0xfa   : > { %826 = vmatpush1.msra.mxu0 %v758_v39 }
  0xfb   : > { %827 = vmatprep.subr.mxu0 %v757_v41  ;;  %v997_v41 = vld [vmem:[%s2640_s10 + $0x10] sm:$0xff] }
  0xfc   : > { %828 = vmatpush1.msra.mxu0 %v756_v43  ;;  %v999_v43 = vld [vmem:[%s2640_s10 + $0x20] sm:$0xff] }
  0xfd   : > { %829 = vmatprep.subr.mxu0 %v755_v44  ;;  %v1000_v44 = vld [vmem:[%s2640_s10 + $0x28] sm:$0xff] }
  0xfe   : > { %830 = vmatpush1.msra.mxu0 %v754_v45  ;;  %v1001_v45 = vld [vmem:[%s2640_s10 + $0x30] sm:$0xff] }
  0xff   : > { %831 = vmatprep.subr.mxu0 %v753_v46  ;;  %v1002_v46 = vld [vmem:[%s2640_s10 + $0x38] sm:$0xff] }
 0x100   : > { %832 = vmatpush1.msra.mxu0 %v752_v47  ;;  %v1003_v47 = vld [vmem:[%s2640_s10 + $0x40] sm:$0xff] }
 0x101   : > { %1823 = vmatmul.mubr.msk.f32.vlgmr.msra.gmra.mxu0 %vm788_vm2, %v760_v48  ;;  %v1004_v48 = vld [vmem:[%s2640_s10 + $0x48] sm:$0xff] }
 0x102   : > { %871 = vmatprep.mubr.f32.mxu0 %v1969_v5 }
 0x105   : > { %1824 = vmatmul.mubr.msk.f32.gmra.mxu0 %vm788_vm2, %v761_v49  ;;  %v1005_v49 = vld [vmem:[%s2640_s10 + $0x50] sm:$0xff] }
 0x106   : > { %877 = vmatprep.mubr.f32.mxu0 %v1969_v5 }
 0x109   : > { %1825 = vmatmul.mubr.msk.f32.gmra.mxu0 %vm788_vm2, %v762_v50  ;;  %v1006_v50 = vld [vmem:[%s2640_s10 + $0x58] sm:$0xff] }
 0x10a   : > { %883 = vmatprep.mubr.f32.mxu0 %v1969_v5 }
 0x10d   : > { %1826 = vmatmul.mubr.msk.f32.gmra.mxu0 %vm788_vm2, %v763_v51  ;;  %v1007_v51 = vld [vmem:[%s2640_s10 + $0x60] sm:$0xff] }
 0x10e   : > { %982 = vmatprep.mubr.f32.mxu0 %v1969_v5 }
 0x1c1   : > { %v867_v52 = vpop.f32.mrf.mxu0 }
 0x1c2   : > { %v868_v15 = vadd.f32 %v867_v52, %v771_v10  ;;  %v1008_v52 = vld [vmem:[%s2640_s10 + $0x68] sm:$0xff] }
 0x1c3   : > { %v869_v53 = vpop.f32.mrf.mxu0 }
 0x1c4   : > { %v870_v13 = vadd.f32 %v869_v53, %v771_v10  ;;  %v890_v20 = vmax.f32 %v868_v15, 0.0  ;;  %v1009_v53 = vld [vmem:[%s2640_s10 + $0x70] sm:$0xff] }
 0x1c5   : > { %v873_v54 = vpop.f32.mrf.mxu0 }
 0x1c6   : > { %v874_v11 = vadd.f32 %v873_v54, %v776_v6  ;;  %v891_v19 = vmax.f32 %v870_v13, 0.0  ;;  %v1010_v54 = vld [vmem:[%s2640_s10 + $0x78] sm:$0xff] }
 0x1c7   : > { %v875_v55 = vpop.f32.mrf.mxu0 }
 0x1c8   : > { %v876_v8 = vadd.f32 %v875_v55, %v776_v6  ;;  %v892_v18 = vmax.f32 %v874_v11, 0.0  ;;  %v1105_v55 = vpop.permute.xlu0 %1104 }
 0x1c9   : > { %v879_v58 = vpop.f32.mrf.mxu0 }
 0x1ca   : > { %v880_v7 = vadd.f32 %v879_v58, %v781_v61  ;;  %v893_v17 = vmax.f32 %v876_v8, 0.0 }
 0x1cb   : > { %v881_v60 = vpop.f32.mrf.mxu0 }
 0x1cc   : > { %v882_v3 = vadd.f32 %v881_v60, %v781_v61  ;;  %v894_v16 = vmax.f32 %v880_v7, 0.0 }
 0x1cd   : > { %v885_v0 = vpop.f32.mrf.mxu0 }
 0x1ce   : > { %v886_v1 = vadd.f32 %v885_v0, %v786_v59  ;;  %v895_v14 = vmax.f32 %v882_v3, 0.0  ;;  %v1443_v0 = vpop.permute.xlu0 %1442 }
 0x1cf   : > { %v887_v2 = vpop.f32.mrf.mxu0 }
 0x1d0   : > { %v888_v4 = vadd.f32 %v887_v2, %v786_v59  ;;  %v896_v12 = vmax.f32 %v886_v1, 0.0  ;;  %v1100_v59 = vpop.permute.xlu1 %1099 }
 0x1d2   : > { %v897_v9 = vmax.f32 %v888_v4, 0.0  ;;  %v1438_v4 = vpop.permute.xlu0 %1437 }
 0x1d4   : > { %942 = vmatprep.subr.mxu0 %v897_v9  ;;  %v1095_v2 = vpop.permute.xlu1 %1094 }
 0x1d5   : > { %943 = vmatpush1.msra.mxu0 %v896_v12 }
 0x1d6   : > { %944 = vmatprep.subr.mxu0 %v895_v14  ;;  %v1433_v10 = vpop.permute.xlu0 %1432 }
 0x1d7   : > { %945 = vmatpush1.msra.mxu0 %v894_v16 }
 0x1d8   : > { %946 = vmatprep.subr.mxu0 %v893_v17  ;;  %v1090_v7 = vpop.permute.xlu1 %1089 }
 0x1d9   : > { %947 = vmatpush1.msra.mxu0 %v892_v18 }
 0x1da   : > { %948 = vmatprep.subr.mxu0 %v891_v19  ;;  %v2440_v15 = vpop.permute.xlu0 %1427 }
 0x1db   : > { %949 = vmatpush1.msra.mxu0 %v890_v20 }
 0x1dc   : > { %1827 = vmatmul.mubr.msk.f32.vlgmr.msra.gmra.mxu0 %vm788_vm2, %v898_v21  ;;  %v1085_v12 = vpop.permute.xlu1 %1084 }
 0x1dd   : > { %988 = vmatprep.mubr.f32.mxu0 %v1969_v5 }
 0x1de   : > { %v2450_v20 = vpop.permute.xlu0 %1422 }
 0x1e0   : > { %1828 = vmatmul.mubr.msk.f32.gmra.mxu0 %vm788_vm2, %v899_v22  ;;  %v2444_v17 = vpop.permute.xlu1 %1079 }
 0x1e1   : > { %1580 = vmatprep.mubr.f32.mxu0 %v1969_v5 }
 0x1e4   : > { %v2454_v22 = vpop.permute.xlu1 %1074 }
 0x29c   : > { %v984_v24 = vpop.f32.mrf.mxu0 }
 0x29d   : > { %v985_v25 = vadd.f32 %v984_v24, %v905_v23 }
 0x29e   : > { %v986_v26 = vpop.f32.mrf.mxu0 }
 0x29f   : > { %v1697_v27 = vrot.slane %v985_v25, 3  ;;  %v987_v28 = vadd.f32 %v986_v26, %v905_v23 }
 0x2a0   : > { %v990_v30 = vpop.f32.mrf.mxu0 }
 0x2a1   : > { %1709 = vst [vmem:[%s2329_s29] sm:$0xe0] %v1697_v27  ;;  %v1698_v31 = vrot.slane %v987_v28, 3  ;;  %v991_v32 = vadd.f32 %v990_v30, %v910_v29 }
 0x2a2   : > { %v992_v33 = vpop.f32.mrf.mxu0 }
 0x2a3   : > { %1710 = vst [vmem:[%s2329_s29 + $0x8] sm:$0xe0] %v1698_v31  ;;  %v1699_v34 = vrot.slane %v991_v32, 3  ;;  %v993_v35 = vadd.f32 %v992_v33, %v910_v29 }
 0x2a5   : > { %v1700_v36 = vsel %vm1696_vm3, %v1697_v27, %v1699_v34  ;;  %1713 = vst [vmem:[%s2329_s29 + $0x20] sm:$0x1f] %v1699_v34  ;;  %v1701_v37 = vrot.slane %v993_v35, 3  ;;  %1184 = vmatprep.subr.mxu1 %v993_v35  ;;  %v2464_v27 = vpop.permute.xlu1 %1069 }
 0x2a6   : > { %1711 = vst [vmem:[%s2329_s29 + $0x10] sm:$0xff] %v1700_v36  ;;  %1185 = vmatpush1.msra.mxu1 %v991_v32 }
 0x2a7   : > { %v1702_v39 = vsel %vm1696_vm3, %v1698_v31, %v1701_v37  ;;  %1714 = vst [vmem:[%s2329_s29 + $0x28] sm:$0x1f] %v1701_v37  ;;  %1186 = vmatprep.subr.mxu1 %v987_v28 }
 0x2a8   : > { %1712 = vst [vmem:[%s2329_s29 + $0x18] sm:$0xff] %v1702_v39  ;;  %1187 = vmatpush1.msra.mxu1 %v985_v25  ;;  %v2460_v25 = vpop.permute.xlu0 %1417 }
 0x2a9   : > { %1829 = vmatmul.mubr.msk.f32.vlgmr.msra.gmra.mxu1 %vm1107_vm4, %v995_v38  ;;  %v2468_v32 = vpop.permute.xlu1 %1064 }
 0x2aa   : > { %1226 = vmatprep.mubr.f32.mxu1 %v1969_v5 }
 0x2ac   : > { %v2466_v30 = vpop.permute.xlu0 %1412 }
 0x2ad   : > { %1830 = vmatmul.mubr.msk.f32.gmra.mxu1 %vm1107_vm4, %v996_v40  ;;  %v2472_v37 = vpop.permute.xlu1 %1059 }
 0x2ae   : > { %1232 = vmatprep.mubr.f32.mxu1 %v1969_v5 }
 0x2b0   : > { %v2470_v35 = vpop.permute.xlu0 %1407 }
 0x2b1   : > { %1831 = vmatmul.mubr.msk.f32.gmra.mxu1 %vm1107_vm4, %v997_v41 }
 0x2b2   : > { %1238 = vmatprep.mubr.f32.mxu1 %v1969_v5 }
 0x2b4   : > { %v2474_v40 = vpop.permute.xlu0 %1402 }
 0x2b5   : > { %1832 = vmatmul.mubr.msk.f32.gmra.mxu1 %vm1107_vm4, %v998_v42  ;;  %v2476_v42 = vpop.permute.xlu1 %1054 }
 0x2b6   : > { %1244 = vmatprep.mubr.f32.mxu1 %v1969_v5 }
 0x2b9   : > { %1833 = vmatmul.mubr.msk.f32.gmra.mxu1 %vm1107_vm4, %v999_v43 }
 0x2ba   : > { %1250 = vmatprep.mubr.f32.mxu1 %v1969_v5 }
 0x2bd   : > { %1834 = vmatmul.mubr.msk.f32.gmra.mxu1 %vm1107_vm4, %v1000_v44 }
 0x2be   : > { %1256 = vmatprep.mubr.f32.mxu1 %v1969_v5 }
 0x2c1   : > { %1835 = vmatmul.mubr.msk.f32.gmra.mxu1 %vm1107_vm4, %v1001_v45  ;;  %v2478_v45 = vpop.permute.xlu0 %1397 }
 0x2c2   : > { %1262 = vmatprep.mubr.f32.mxu1 %v1969_v5 }
 0x2c5   : > { %1836 = vmatmul.mubr.msk.f32.gmra.mxu1 %vm1107_vm4, %v1002_v46 }
 0x2c6   : > { %1268 = vmatprep.mubr.f32.mxu1 %v1969_v5 }
 0x2c9   : > { %1837 = vmatmul.mubr.msk.f32.gmra.mxu1 %vm1107_vm4, %v1003_v47 }
 0x2ca   : > { %1274 = vmatprep.mubr.f32.mxu1 %v1969_v5 }
 0x2cd   : > { %1838 = vmatmul.mubr.msk.f32.gmra.mxu1 %vm1107_vm4, %v1004_v48 }
 0x2ce   : > { %1280 = vmatprep.mubr.f32.mxu1 %v1969_v5 }
 0x2d1   : > { %1839 = vmatmul.mubr.msk.f32.gmra.mxu1 %vm1107_vm4, %v1005_v49  ;;  %v2480_v49 = vpop.permute.xlu1 %1049 }
 0x2d2   : > { %1286 = vmatprep.mubr.f32.mxu1 %v1969_v5 }
 0x2d5   : > { %1840 = vmatmul.mubr.msk.f32.gmra.mxu1 %vm1107_vm4, %v1006_v50 }
 0x2d6   : > { %1292 = vmatprep.mubr.f32.mxu1 %v1969_v5 }
 0x2d9   : > { %1841 = vmatmul.mubr.msk.f32.gmra.mxu1 %vm1107_vm4, %v1007_v51 }
 0x2da   : > { %1298 = vmatprep.mubr.f32.mxu1 %v1969_v5 }
 0x2dd   : > { %1842 = vmatmul.mubr.msk.f32.gmra.mxu1 %vm1107_vm4, %v1008_v52 }
 0x2de   : > { %1304 = vmatprep.mubr.f32.mxu1 %v1969_v5 }
 0x2e1   : > { %1843 = vmatmul.mubr.msk.f32.gmra.mxu1 %vm1107_vm4, %v1009_v53 }
 0x2e2   : > { %1310 = vmatprep.mubr.f32.mxu1 %v1969_v5 }
 0x2e5   : > { %1844 = vmatmul.mubr.msk.f32.gmra.mxu1 %vm1107_vm4, %v1010_v54 }
 0x369   : > { %v2416_v58 = vpop.f32.mrf.mxu1 }
 0x36a   : > { %2672 = vst [vmem:[#allocation14_spill] sm:$0xff] %v2416_v58  ;;  %v2482_v58 = vpop.permute.xlu0 %1392 }
 0x36b   : > { %v2418_v60 = vpop.f32.mrf.mxu1 }
 0x36c   : > { %2673 = vst [vmem:[#allocation15_spill] sm:$0xff] %v2418_v60 }
 0x36d   : > { %v2420_v61 = vpop.f32.mrf.mxu1 }
 0x36e   : > { %2674 = vst [vmem:[#allocation16_spill] sm:$0xff] %v2420_v61 }
 0x36f   : > { %v2422_v1 = vpop.f32.mrf.mxu1 }
 0x370   : > { %2675 = vst [vmem:[#allocation17_spill] sm:$0xff] %v2422_v1 }
 0x371   : > { %v2424_v3 = vpop.f32.mrf.mxu1 }
 0x373   : > { %v2426_v5 = vpop.f32.mrf.mxu1 }
 0x375   : > { %v2428_v6 = vpop.f32.mrf.mxu1 }
 0x377   : > { %v2430_v8 = vpop.f32.mrf.mxu1 }
 0x379   : > { %v2432_v9 = vpop.f32.mrf.mxu1 }
 0x37b   : > { %v2434_v11 = vpop.f32.mrf.mxu1 }
 0x37d   : > { %v2436_v13 = vpop.f32.mrf.mxu1 }
 0x37f   : > { %v2438_v14 = vpop.f32.mrf.mxu1 }
 0x381   : > { %v2442_v16 = vpop.f32.mrf.mxu1 }
 0x383   : > { %v2446_v18 = vpop.f32.mrf.mxu1 }
 0x385   : > { %v2448_v19 = vpop.f32.mrf.mxu1 }
 0x387   : > { %v2452_v21 = vpop.f32.mrf.mxu1 }
 0x389   : > { %v2456_v23 = vpop.f32.mrf.mxu1 }
 0x38b   : > { %v2458_v24 = vpop.f32.mrf.mxu1 }
 0x38d   : > { %v2462_v26 = vpop.f32.mrf.mxu1 }
 0x38f   : > { %v1278_v28 = vpop.f32.mrf.mxu1 }
 0x391   : > { %v1282_v29 = vpop.f32.mrf.mxu1 }
 0x393   : > { %v1284_v31 = vpop.f32.mrf.mxu1 }
 0x395   : > { %v1288_v33 = vpop.f32.mrf.mxu1 }
 0x397   : > { %v1290_v34 = vpop.f32.mrf.mxu1 }
 0x399   : > { %v1294_v36 = vpop.f32.mrf.mxu1 }
 0x39a   : > { %v1295_v60 = vadd.f32 %v1294_v36, %v1090_v7  ;;  %v1265_v36 = vadd.f32 %v2448_v19, %v2468_v32 }
 0x39b   : > { %v1296_v38 = vpop.f32.mrf.mxu1 }
 0x39c   : > { %v1297_v54 = vadd.f32 %v1296_v38, %v1090_v7  ;;  %v1285_v38 = vadd.f32 %v1284_v31, %v2444_v17  ;;  %vm1357_vm12 = vcmp.gt.f32.partialorder %v1295_v60, 0.0 }
 0x39d   : > { %v1300_v39 = vpop.f32.mrf.mxu1 }
 0x39e   : > { %v1301_v56 = vadd.f32 %v1300_v39, %v1095_v2  ;;  %vm1358_vm11 = vcmp.gt.f32.partialorder %v1297_v54, 0.0  ;;  %vm1354_vm15 = vcmp.gt.f32.partialorder %v1285_v38, 0.0 }
 0x39f   : > { %v1302_v41 = vpop.f32.mrf.mxu1 }
 0x3a0   : > { %v1303_v52 = vadd.f32 %v1302_v41, %v1095_v2  ;;  %v1289_v41 = vadd.f32 %v1288_v33, %v1085_v12  ;;  %vm1359_vm10 = vcmp.gt.f32.partialorder %v1301_v56, 0.0 }
 0x3a1   : > { %v1306_v43 = vpop.f32.mrf.mxu1 }
 0x3a2   : > { %v1307_v50 = vadd.f32 %v1306_v43, %v1100_v59  ;;  %vm1360_vm9 = vcmp.gt.f32.partialorder %v1303_v52, 0.0  ;;  %vm1355_vm14 = vcmp.gt.f32.partialorder %v1289_v41, 0.0  ;;  %v1259_v43 = vadd.f32 %v2442_v16, %v2472_v37 }
 0x3a3   : > { %v1308_v44 = vpop.f32.mrf.mxu1  ;;  %v1459_v16 = vmul.f32 %v2474_v40, %v1265_v36 }
 0x3a4   : > { %v1309_v47 = vadd.f32 %v1308_v44, %v1100_v59  ;;  %v1473_v61 = vmul.f32 %v1438_v4, %v1307_v50  ;;  %v1291_v44 = vadd.f32 %v1290_v34, %v1085_v12  ;;  %vm1361_vm8 = vcmp.gt.f32.partialorder %v1307_v50, 0.0  ;;  %v2484_v59 = vpop.permute.xlu1 %1044  ;;  %v2493_v12 = vpop.permute.xlu0 %1387 }
 0x3a5   : > { %v1312_v46 = vpop.f32.mrf.mxu1  ;;  %v1469_v34 = vmul.f32 %v2440_v15, %v1295_v60 }
 0x3a6   : > { %v1313_v48 = vadd.f32 %v1312_v46, %v1105_v55  ;;  %v1474_v62 = vmul.f32 %v1438_v4, %v1309_v47  ;;  %vm1362_vm7 = vcmp.gt.f32.partialorder %v1309_v47, 0.0  ;;  %v1472_v46 = vmul.f32 %v1433_v10, %v1303_v52 }
 0x3a7   : > { %v1314_v51 = vpop.f32.mrf.mxu1  ;;  %v1283_v4 = vadd.f32 %v1282_v29, %v2444_v17  ;;  %v1467_v17 = vmul.f32 %v2450_v20, %v1289_v41  ;;  %vm1356_vm13 = vcmp.gt.f32.partialorder %v1291_v44, 0.0 }
 0x3a8   : > { %v1315_v53 = vadd.f32 %v1314_v51, %v1105_v55  ;;  %v1475_v57 = vmul.f32 %v1443_v0, %v1313_v48  ;;  %vm1363_vm5 = vcmp.gt.f32.partialorder %v1313_v48, 0.0  ;;  %v1471_v55 = vmul.f32 %v1433_v10, %v1301_v56  ;;  %v2503_v31 = vpop.permute.xlu1 %1039  ;;  %v1383_v39 = vpop.permute.xlu0 %1382 }
 0x3a9   : > { %v1506_v7 = vsel %vm1362_vm7, %v1309_v47, %v1474_v62  ;;  %v1279_v10 = vadd.f32 %v1278_v28, %v2454_v22  ;;  %v1277_v62 = vadd.f32 %v2462_v26, %v2454_v22  ;;  %v1466_v28 = vmul.f32 %v2460_v25, %v1285_v38 }
 0x3aa   : > { %v1476_v63 = vmul.f32 %v1443_v0, %v1315_v53  ;;  %vm1364_vm6 = vcmp.gt.f32.partialorder %v1315_v53, 0.0  ;;  %v1507_v2 = vsel %vm1363_vm5, %v1313_v48, %v1475_v57  ;;  %v1470_v0 = vmul.f32 %v2440_v15, %v1297_v54 }
 0x3ab   : > { %v1468_v57 = vmul.f32 %v2450_v20, %v1291_v44  ;;  %v1503_v15 = vsel %vm1359_vm10, %v1301_v56, %v1471_v55  ;;  %v1271_v22 = vadd.f32 %v2456_v23, %v2464_v27  ;;  %v1465_v20 = vmul.f32 %v2460_v25, %v1283_v4 }
 0x3ac   : > { %v1508_v1 = vsel %vm1364_vm6, %v1315_v53, %v1476_v63  ;;  %v1505_v63 = vsel %vm1361_vm8, %v1307_v50, %v1473_v61  ;;  %v1273_v61 = vadd.f32 %v2458_v24, %v2464_v27  ;;  %v1502_v29 = vsel %vm1358_vm11, %v1297_v54, %v1470_v0  ;;  %v1035_v48 = vpop.permute.xlu1 %1034  ;;  %v1378_v54 = vpop.permute.xlu0 %1377  ;;  %v2677_v0 = vld [vmem:[#allocation16_spill] sm:$0xff] }
 0x3ad   : > { %1516 = vmatprep.subr.mxu0 %v1508_v1  ;;  %v1504_v1 = vsel %vm1360_vm9, %v1303_v52, %v1472_v46  ;;  %v1501_v56 = vsel %vm1357_vm12, %v1295_v60, %v1469_v34  ;;  %v1267_v24 = vadd.f32 %v2452_v21, %v2468_v32  ;;  %v1464_v26 = vmul.f32 %v2466_v30, %v1279_v10 }
 0x3ae   : > { %1517 = vmatpush1.msra.mxu0 %v1507_v2  ;;  %vm1353_vm0 = vcmp.gt.f32.partialorder %v1283_v4, 0.0  ;;  %v1500_v33 = vsel %vm1356_vm13, %v1291_v44, %v1468_v57  ;;  %v1463_v23 = vmul.f32 %v2466_v30, %v1277_v62  ;;  %v1499_v25 = vsel %vm1355_vm14, %v1289_v41, %v1467_v17 }
 0x3af   : > { %1518 = vmatprep.subr.mxu0 %v1506_v7  ;;  %vm1352_vm1 = vcmp.gt.f32.partialorder %v1279_v10, 0.0  ;;  %v1261_v60 = vadd.f32 %v2446_v18, %v2472_v37  ;;  %v1462_v21 = vmul.f32 %v2470_v35, %v1273_v61  ;;  %vm1351_vm2 = vcmp.gt.f32.partialorder %v1277_v62, 0.0 }
 0x3b0   : > { %1519 = vmatpush1.msra.mxu0 %v1505_v63  ;;  %v1498_v27 = vsel %vm1354_vm15, %v1285_v38, %v1466_v28  ;;  %v1461_v19 = vmul.f32 %v2470_v35, %v1271_v22  ;;  %v1497_v30 = vsel %vm1353_vm0, %v1283_v4, %v1465_v20  ;;  %vm1350_vm3 = vcmp.gt.f32.partialorder %v1273_v61, 0.0  ;;  %v1030_v41 = vpop.permute.xlu1 %1029 }
 0x3b1   : > { %1520 = vmatprep.subr.mxu0 %v1504_v1  ;;  %v1255_v32 = vadd.f32 %v2438_v14, %v2476_v42  ;;  %v1460_v18 = vmul.f32 %v2474_v40, %v1267_v24  ;;  %vm1349_vm4 = vcmp.gt.f32.partialorder %v1271_v22, 0.0  ;;  %v1496_v47 = vsel %vm1352_vm1, %v1279_v10, %v1464_v26  ;;  %v1373_v1 = vpop.permute.xlu0 %1372 }
 0x3b2   : > { %1521 = vmatpush1.msra.mxu0 %v1503_v15  ;;  %v1253_v50 = vadd.f32 %v2436_v13, %v2476_v42  ;;  %v1495_v35 = vsel %vm1351_vm2, %v1277_v62, %v1463_v23  ;;  %vm1348_vm5 = vcmp.gt.f32.partialorder %v1267_v24, 0.0  ;;  %v1249_v37 = vadd.f32 %v2434_v11, %v2480_v49 }
 0x3b3   : > { %1522 = vmatprep.subr.mxu0 %v1502_v29  ;;  %v1458_v14 = vmul.f32 %v2478_v45, %v1261_v60  ;;  %vm1347_vm6 = vcmp.gt.f32.partialorder %v1265_v36, 0.0  ;;  %v1494_v51 = vsel %vm1350_vm3, %v1273_v61, %v1462_v21  ;;  %v1247_v52 = vadd.f32 %v2432_v9, %v2480_v49  ;;  %v1599_v21 = vld [vmem:[%s558_s23] sm:$0x3] }
 0x3b4   : > { %1523 = vmatpush1.msra.mxu0 %v1501_v56  ;;  %v1457_v13 = vmul.f32 %v2478_v45, %v1259_v43  ;;  %v1493_v40 = vsel %vm1349_vm4, %v1271_v22, %v1461_v19  ;;  %vm1346_vm7 = vcmp.gt.f32.partialorder %v1261_v60, 0.0  ;;  %v1243_v42 = vadd.f32 %v2430_v8, %v2484_v59  ;;  %v1368_v29 = vpop.permute.xlu1 %1367 }
 0x3b5   : > { %1524 = vmatprep.subr.mxu0 %v1500_v33  ;;  %v1456_v11 = vmul.f32 %v2482_v58, %v1255_v32  ;;  %vm1345_vm8 = vcmp.gt.f32.partialorder %v1259_v43, 0.0  ;;  %v1492_v53 = vsel %vm1348_vm5, %v1267_v24, %v1460_v18  ;;  %v1241_v44 = vadd.f32 %v2428_v6, %v2484_v59  ;;  %v2676_v59 = vld [vmem:[#allocation17_spill] sm:$0xff]  ;;  %v1514_v19 = vpop.permute.xlu0 %1513 }
 0x3b6   : > { %1525 = vmatpush1.msra.mxu0 %v1499_v25  ;;  %v1455_v9 = vmul.f32 %v2482_v58, %v1253_v50  ;;  %v1491_v45 = vsel %vm1347_vm6, %v1265_v36, %v1459_v16  ;;  %vm1344_vm9 = vcmp.gt.f32.partialorder %v1255_v32, 0.0  ;;  %v1237_v49 = vadd.f32 %v2426_v5, %v2503_v31  ;;  %v1509_v25 = vld [vmem:[%s2643_s13] sm:$0x1f] }
 0x3b7   : > { %1526 = vmatprep.subr.mxu0 %v1498_v27  ;;  %v1454_v8 = vmul.f32 %v2493_v12, %v1249_v37  ;;  %vm1343_vm10 = vcmp.gt.f32.partialorder %v1253_v50, 0.0  ;;  %v1490_v46 = vsel %vm1346_vm7, %v1261_v60, %v1458_v14  ;;  %v1235_v55 = vadd.f32 %v2424_v3, %v2503_v31  ;;  %v2678_v3 = vld [vmem:[#allocation15_spill] sm:$0xff] }
 0x3b8   : > { %1527 = vmatpush1.msra.mxu0 %v1497_v30  ;;  %v1453_v6 = vmul.f32 %v2493_v12, %v1247_v52  ;;  %v1489_v58 = vsel %vm1345_vm8, %v1259_v43, %v1457_v13  ;;  %vm1342_vm11 = vcmp.gt.f32.partialorder %v1249_v37, 0.0  ;;  %v1231_v2 = vadd.f32 %v2676_v59, %v1035_v48  ;;  %v2679_v12 = vld [vmem:[#allocation14_spill] sm:$0xff]  ;;  %v1593_v18 = vpop.permute.xlu1 %1592 }
 0x3b9   : > { %1528 = vmatprep.subr.mxu0 %v1496_v47  ;;  %v1452_v38 = vmul.f32 %v1383_v39, %v1243_v42  ;;  %vm1341_vm12 = vcmp.gt.f32.partialorder %v1247_v52, 0.0  ;;  %v1488_v5 = vsel %vm1344_vm9, %v1255_v32, %v1456_v11  ;;  %v1229_v7 = vadd.f32 %v2677_v0, %v1035_v48  ;;  %v2680_v47 = vld [vmem:[#allocation13_spill] sm:$0xff] }
 0x3ba   : > { %1529 = vmatpush1.msra.mxu0 %v1495_v35  ;;  %v1451_v4 = vmul.f32 %v1383_v39, %v1241_v44  ;;  %v1487_v34 = vsel %vm1343_vm10, %v1253_v50, %v1455_v9  ;;  %vm1340_vm13 = vcmp.gt.f32.partialorder %v1243_v42, 0.0  ;;  %v1225_v63 = vadd.f32 %v2678_v3, %v1030_v41 }
 0x3bb   : > { %1530 = vmatprep.subr.mxu0 %v1494_v51  ;;  %v1450_v10 = vmul.f32 %v1378_v54, %v1237_v49  ;;  %vm1339_vm14 = vcmp.gt.f32.partialorder %v1241_v44, 0.0  ;;  %v1486_v57 = vsel %vm1342_vm11, %v1249_v37, %v1454_v8  ;;  %v1223_v62 = vadd.f32 %v2679_v12, %v1030_v41  ;;  %v2681_v37 = vld [vmem:[#allocation12_spill] sm:$0xff] }
 0x3bc   : > { %1531 = vmatpush1.msra.mxu0 %v1493_v40  ;;  %v1449_v17 = vmul.f32 %v1378_v54, %v1235_v55  ;;  %v1485_v15 = vsel %vm1341_vm12, %v1247_v52, %v1453_v6  ;;  %vm1338_vm15 = vcmp.gt.f32.partialorder %v1237_v49, 0.0  ;;  %v1448_v61 = vmul.f32 %v1373_v1, %v1231_v2 }
 0x3bd   : > { %1532 = vmatprep.subr.mxu0 %v1492_v53  ;;  %vm1337_vm0 = vcmp.gt.f32.partialorder %v1235_v55, 0.0  ;;  %v1484_v28 = vsel %vm1340_vm13, %v1243_v42, %v1452_v38  ;;  %v1447_v31 = vmul.f32 %v1373_v1, %v1229_v7  ;;  %v1483_v22 = vsel %vm1339_vm14, %v1241_v44, %v1451_v4 }
 0x3be   : > { %1533 = vmatpush1.msra.mxu0 %v1491_v45  ;;  %vm1336_vm1 = vcmp.gt.f32.partialorder %v1231_v2, 0.0  ;;  %v1446_v20 = vmul.f32 %v1368_v29, %v1225_v63  ;;  %vm1335_vm2 = vcmp.gt.f32.partialorder %v1229_v7, 0.0  ;;  %v1482_v56 = vsel %vm1338_vm15, %v1237_v49, %v1450_v10 }
 0x3bf   : > { %1534 = vmatprep.subr.mxu0 %v1490_v46  ;;  %v1445_v24 = vmul.f32 %v1368_v29, %v1223_v62  ;;  %v1481_v26 = vsel %vm1337_vm0, %v1235_v55, %v1449_v17  ;;  %vm1334_vm3 = vcmp.gt.f32.partialorder %v1225_v63, 0.0  ;;  %vm1333_vm4 = vcmp.gt.f32.partialorder %v1223_v62, 0.0 }
 0x3c0   : > { %1535 = vmatpush1.msra.mxu0 %v1489_v58  ;;  %v1480_v33 = vsel %vm1336_vm1, %v1231_v2, %v1448_v61  ;;  %v1479_v36 = vsel %vm1335_vm2, %v1229_v7, %v1447_v31  ;;  %v1478_v23 = vsel %vm1334_vm3, %v1225_v63, %v1446_v20  ;;  %v1845_v27 = vadd.f32 -46.02, %v1599_v21 }
 0x3c1   : > { %1536 = vmatprep.subr.mxu0 %v1488_v5  ;;  %v1477_v60 = vsel %vm1333_vm4, %v1223_v62, %v1445_v24  ;;  %v1970_v59 = vmov 1966171168   ;;  %v2683_v20 = vlaneseq }
 0x3c2   : > { %1537 = vmatpush1.msra.mxu0 %v1487_v34  ;;  %1900 = vrcp.f32 %v1845_v27  ;;  %v1669_v2 = vunpack.c.l.s4 %v1970_v59 }
 0x3c3   : > { %1538 = vmatprep.subr.mxu0 %v1486_v57  ;;  %vm1687_vm7 = vcmp.lt.s32.totalorder %v2683_v20, 256 }
 0x3c4   : > { %1539 = vmatpush1.msra.mxu0 %v1485_v15  ;;  %v1670_v10 = vunpack.c.0.s8 %v1669_v2  ;;  %v2682_v15 = vld [vmem:[#allocation11_spill] sm:$0xff] }
 0x3c5   : > { %1540 = vmatprep.subr.mxu0 %v1484_v28 }
 0x3c6   : > { %1541 = vmatpush1.msra.mxu0 %v1483_v22  ;;  %v1673_v61 = vsub.s32 %v1670_v10, %v2682_v15 }
 0x3c7   : > { %1542 = vmatprep.subr.mxu0 %v1482_v56 }
 0x3c8   : > { %1543 = vmatpush1.msra.mxu0 %v1481_v26 }
 0x3c9   : > { %1544 = vmatprep.subr.mxu0 %v1480_v33 }
 0x3ca   : > { %1545 = vmatpush1.msra.mxu0 %v1479_v36 }
 0x3cb   : > { %1546 = vmatprep.subr.mxu0 %v1478_v23 }
 0x3cc   : > { %1547 = vmatpush1.msra.mxu0 %v1477_v60 }
 0x3cd   : > { %1581 = vmatmul.mubr.f32.vlgmr.msra.gmra.mxu0 %v1509_v25 }
 0x3cf   : > { %v1901_v39 = vpop.eup %1900 }
 0x3d0   : > { %v1625_v43 = vsub.f32 -0.027762353, %v1901_v39  ;;  %v1614_v45 = vrot.slane %v1901_v39, %v2680_v47  ;;  %v1618_v8 = vrot.slane %v1901_v39, %v2681_v37 }
 0x3d2   : > { %v1630_v48 = vrot.slane %v1625_v43, %v2680_v47  ;;  %v1634_v14 = vrot.slane %v1625_v43, %v2681_v37 }
 0x48d   : > { %v1582_v30 = vpop.f32.mrf.mxu0 }
 0x48e   : > { %v1583_v32 = vadd.f32 %v1582_v30, %v1514_v19 }
 0x48f   : > { %v1584_v50 = vpop.f32.mrf.mxu0 }
 0x490   : > { %vm1588_vm5 = vcmp.gt.f32.partialorder %v1583_v32, 0.0  ;;  %v1595_v16 = vmul.f32 %v1593_v18, %v1583_v32  ;;  %v1585_v35 = vadd.f32 %v1584_v50, %v1514_v19 }
 0x492   : > { %v1597_v51 = vsel %vm1588_vm5, %v1583_v32, %v1595_v16  ;;  %vm1589_vm6 = vcmp.gt.f32.partialorder %v1585_v35, 0.0  ;;  %v1596_v52 = vmul.f32 %v1593_v18, %v1585_v35 }
 0x493   : > { %v1637_v13 = vmul.f32 %v1630_v48, %v1597_v51  ;;  %1663 = vst [vmem:[%s2329_s29] sm:$0xf] %v1597_v51  ;;  %v1604_v54 = vrot.slane %v1597_v51, 7  ;;  %v1651_v0 = vrot.slane %v1597_v51, 6  ;;  %v1657_v57 = vrot.slane %v1597_v51, 1 }
 0x494   : > { %v1598_v40 = vsel %vm1589_vm6, %v1585_v35, %v1596_v52 }
 0x495   : > { %v1639_v42 = vmul.f32 1.442695, %v1637_v13  ;;  %v1638_v11 = vmul.f32 %v1634_v14, %v1598_v40  ;;  %1664 = vst [vmem:[%s2329_s29 + $0x8] sm:$0xf] %v1598_v40  ;;  %v1605_v44 = vrot.slane %v1598_v40, 7  ;;  %v1608_v9 = vmul.f32 %v1604_v54, %v1597_v51 }
 0x496   : > { %v1652_v63 = vrot.slane %v1598_v40, 6  ;;  %v1658_v12 = vrot.slane %v1598_v40, 1 }
 0x497   : > { %1902 = vpow2.f32 %v1639_v42  ;;  %v1641_v53 = vmul.f32 1.442695, %v1638_v11  ;;  %v1609_v49 = vmul.f32 %v1605_v44, %v1598_v40  ;;  %v1621_v46 = vmul.f32 %v1614_v45, %v1608_v9 }
 0x499   : > { %1904 = vpow2.f32 %v1641_v53  ;;  %v1622_v41 = vmul.f32 %v1618_v8, %v1609_v49  ;;  %v1623_v6 = vmul.f32 %v1621_v46, %v1614_v45 }
 0x49b   : > { %v1624_v7 = vmul.f32 %v1622_v41, %v1618_v8 }
 0x4a4   : > { %v1903_v55 = vpop.eup %1902 }
 0x4a5   : > { %v1645_v58 = vrot.slane %v1903_v55, 7 }
 0x4a6   : > { %v1905_v38 = vpop.eup %1904 }
 0x4a7   : > { %v1649_v5 = vmul.f32 %v1645_v58, %v1623_v6  ;;  %v1646_v4 = vrot.slane %v1905_v38, 7 }
 0x4a9   : > { %v1655_v34 = vmul.f32 %v1651_v0, %v1649_v5  ;;  %v1650_v3 = vmul.f32 %v1646_v4, %v1624_v7 }
 0x4ab   : > { %v1656_v1 = vmul.f32 %v1652_v63, %v1650_v3  ;;  %v1661_v62 = vadd.f32 %v1657_v57, %v1655_v34 }
 0x4ad   : > { %v1662_v17 = vadd.f32 %v1658_v12, %v1656_v1 }
 0x4af   : > { %v1667_v28 = vcombine.low %v1661_v62, %v1662_v17 }
 0x4b1   : > { %v1674_v29 = vrot.slane %v1667_v28, %v1673_v61 }
 0x4b3   : > { %v1675_v31 = vcombine.high %v1674_v29, %v1674_v29 }
 0x4b5   : > { %v1682_v22 = vrot.slane %v1675_v31, %v1673_v61 }
 0x4b7   : > { %v1683_v56 = vcombine.high %v1682_v22, %v1682_v22 }
 0x4b9   : > { %1846 = vst.msk [vmem:[%s2329_s29 + $0x4] ss:$8 sm:$0x3] %vm1687_vm7, %v1683_v56 }
 0x4ba   : > { %1919 = shalt.err (!%p1916_p3)
}
 0x4bb   : > { %s1920_s21 = scalar_lea.hbm %s2585_s19, 768  ;;  %s1924_s27 = scalar_lea.hbm %s2646_s16, 2304 }
 0x4bc   : > { %p1921_p4 = scmp.ne.s32.totalorder %s2585_s19, %s1920_s21  ;;  %p1925_p9 = scmp.lt.s32.totalorder %s2585_s19, %s2646_s16 }
 0x4bd   : > { %p1926_p10 = scmp.lt.s32.totalorder %s1924_s27, %s1920_s21 }
 0x4be   : > { %p1922_p7 = pnand %p1921_p4, %p2098_p5 }
 0x4bf   : > { %p1927_p11 = por %p1926_p10, %p1925_p9 }
 0x4c0   : > { %p1923_p8 = pneg %p1922_p7 }
 0x4c2   : > { %p1928_p12 = pnand %p1927_p11, %p1923_p8 }
 0x4c4   : > { %1931 = shalt.err (!%p1928_p12)
}
 0x4c5   : > { %s1972_s30 = smov 256   ;;  %s1973_s25 = smov 768  }
 0x4c6   : > { %s1974_s26 = smov 16  }
 0x4c7   : > { %1853 = dma.vmem_to_hbm [thread:$0]  (%p2098_p5), %s2579_s28, 768, %s2585_s19, %s2590_s20, %s1972_s30, %s1973_s25, %s1974_s26  }
 0x4c8 PF: > { %s2684_s24 = sld [smem:[#allocation7_spill]] }
 0x4c9   : > { %s2685_s29 = sld [smem:[#allocation5_spill]] }
 0x4ce   : > { %p1859_p13 = scmp.ge.s32.totalorder %s2684_s24, 2 }
 0x4cf   : > { %s1744_s18 = sand.u32 1, %s2685_s29  }
 0x4d0   : > { %p1856_p0 = pnand %p1859_p13, %p2102_p6  ;;  %s1745_s21 = scalar_lea.sflag [#allocation3], %s1744_s18 }
 0x4d2   : > { %p1857_p1 = pneg %p1856_p0 }
 0x4d4   : > { %1949 = dma.done.wait (%p1857_p1), %s1745_s21, 768  }
 0x4d5   : > { %1951 = vsyncadd (%p1857_p1), %s1745_s21, 4294966528  ;;  %s2687_s24 = sld [smem:[#allocation8_spill]]  ;;  %s2690_s21 = smov %s1958_s22 }
 0x4d6   : > { %s2688_s27 = sld [smem:[#allocation6_spill]] }
 0x4d7   : > { %s2689_s23 = sld [smem:[#allocation9_spill]] }
 0x4db   : > { %p26_p2 = scmp.ge.s32.totalorder %s2687_s24, 5  }
 0x4dc   : > { %s2691_s22 = smov %s2688_s27 }
 0x4dd   :  { %28 = sbr.rel (!%p26_p2) target bundleno = 5 (0x5), region = 126 }
 0x4e2   :  { %1750 = vsyncpa [#allocation3], 1 }
 0x4e3   :  { %1752 = vsyncpa [#allocation3 + $0x1], 1 }

</bundles_post_ra>
